<compile_context>
chip_gen: v7x
topology: tpu7x:2x2x1
jax: 0.10.0
libtpu: 0.0.40
codegen_flags: <defaults>
</compile_context>

<pallas_src>
import functools

import numpy as np
import jax
import jax.numpy as jnp
from jax.experimental import pallas as pl
from jax.experimental.pallas import tpu as pltpu


def _round_up(x: int, m: int) -> int:
    return ((x + m - 1) // m) * m


def _cdiv(a: int, b: int) -> int:
    return (a + b - 1) // b


_RESIDENT_U_MAX_BYTES = 12 * 1024 * 1024   # cap for the double-buffered full-U copy
_VMEM_HARD_CAP = 64 * 1024 * 1024          # fits every generation (v7x: 64 MiB/TC)


def mf_kernel(bi_ref, but_ref, v_ref, u_ref, o_ref, *, u_resident):
    """One (item-tile, user-tile) block: full-depth MXU dot + fused bias add."""
    if u_resident:
        # u_ref holds all user tiles, shape (grid_j, h, tm); pick this step's.
        u = u_ref[pl.program_id(1)]
    else:
        u = u_ref[...]
    acc = jnp.dot(v_ref[...], u, preferred_element_type=jnp.float32)
    o_ref[...] = (acc + bi_ref[...] + but_ref[...]).astype(o_ref.dtype)


@functools.partial(jax.jit, static_argnames=("tn", "tm", "out_dtype"))
def mf_forward(bi, bu, U, V, *, tn=1024, tm=1024, out_dtype=jnp.float32):
    """bi + bu.T + V @ U with a tiled Pallas kernel (K = h_dim kept whole).

    bi: (itemNo, 1), bu: (userNo, 1), U: (h_dim, userNo), V: (itemNo, h_dim)
    returns: (itemNo, userNo) in out_dtype (float32 by default)
    """
    itemNo, h_dim = V.shape
    h_dim_u, userNo = U.shape
    assert h_dim_u == h_dim
    assert bi.shape == (itemNo, 1) and bu.shape == (userNo, 1)

    # Clamp tiles to the problem, keeping sublane (8) / lane (128) alignment.
    tn = min(tn, _round_up(itemNo, 8))
    tm = min(tm, _round_up(userNo, 128))

    # If the whole problem collapses to a (1, 1) grid, split the user axis so
    # both v7x TensorCores (sharded over the "parallel" axes) get work.
    if _cdiv(itemNo, tn) == 1 and _cdiv(userNo, tm) == 1:
        if userNo > 128:
            tm = _round_up(_cdiv(userNo, 2), 128)
        elif itemNo > 8:
            tn = _round_up(_cdiv(itemNo, 2), 8)

    grid_i = _cdiv(itemNo, tn)
    grid_j = _cdiv(userNo, tm)
    user_p = grid_j * tm

    bu_t = bu.T  # (1, userNo) — cheap glue transpose in plain JAX

    # U is tiny (h_dim x userNo); keep it VMEM-resident (one DMA total) when it
    # fits, laid out as (grid_j, h, tm) so the kernel indexes the leading axis.
    h_sub = _round_up(h_dim, 8)
    u_resident = 2 * h_sub * user_p * 4 <= _RESIDENT_U_MAX_BYTES
    if u_resident:
        if user_p != userNo:
            U = jnp.pad(U, ((0, 0), (0, user_p - userNo)))   # small input pad only
        U_op = U.reshape(h_dim, grid_j, tm).transpose(1, 0, 2)
        u_spec = pl.BlockSpec((grid_j, h_dim, tm), lambda i, j: (0, 0, 0))
    else:
        U_op = U
        u_spec = pl.BlockSpec((h_dim, tm), lambda i, j: (0, j))

    # Scoped-VMEM limit from the actual double-buffered footprint (+ margin),
    # capped so it is valid on all generations.
    out_bytes = 2 * tn * tm * np.dtype(out_dtype).itemsize
    v_bytes = 2 * _round_up(tn, 8) * _round_up(h_dim, 128) * 4
    u_bytes = 2 * h_sub * (user_p if u_resident else tm) * 4
    bi_bytes = 2 * _round_up(tn, 8) * 128 * 4      # (tn, 1) tile pads to 128 lanes
    bu_bytes = 2 * 8 * tm * 4
    vmem_limit = min(
        max(out_bytes + v_bytes + u_bytes + bi_bytes + bu_bytes + (8 << 20), 32 << 20),
        _VMEM_HARD_CAP,
    )

    return pl.pallas_call(
        functools.partial(mf_kernel, u_resident=u_resident),
        out_shape=jax.ShapeDtypeStruct((itemNo, userNo), out_dtype),
        grid_spec=pltpu.PrefetchScalarGridSpec(
            num_scalar_prefetch=0,
            grid=(grid_i, grid_j),
            in_specs=[
                pl.BlockSpec((tn, 1), lambda i, j: (i, 0)),       # bi tile
                pl.BlockSpec((1, tm), lambda i, j: (0, j)),       # bu^T tile
                pl.BlockSpec((tn, h_dim), lambda i, j: (i, 0)),   # V stripe (full K)
                u_spec,                                           # U (resident/streamed)
            ],
            out_specs=pl.BlockSpec((tn, tm), lambda i, j: (i, j)),
        ),
        compiler_params=pltpu.CompilerParams(
            dimension_semantics=("parallel", "parallel"),
            vmem_limit_bytes=vmem_limit,
        ),
    )(bi, bu_t, V, U_op)


if __name__ == "__main__":
    # Shapes consistent with the module: h_dim=32, m (users)=256, n (items)=128.
    itemNo, userNo, h_dim = 128, 256, 32
    k_bi, k_bu, k_u, k_v = jax.random.split(jax.random.PRNGKey(0), 4)
    bi = jax.random.uniform(k_bi, (itemNo, 1), dtype=jnp.float32)   # torch.rand -> U[0,1)
    bu = jax.random.uniform(k_bu, (userNo, 1), dtype=jnp.float32)
    U = jax.random.uniform(k_u, (h_dim, userNo), dtype=jnp.float32)
    V = jax.random.uniform(k_v, (itemNo, h_dim), dtype=jnp.float32)

    out = jax.block_until_ready(mf_forward(bi, bu, U, V))
    ref = bi + bu.T + V @ U
    assert out.shape == (itemNo, userNo)
    assert jnp.allclose(out, ref, atol=1e-5, rtol=1e-5)

    # Non-divisible shapes exercise the masked-edge path (no output pad/slice).
    itemNo2, userNo2, h2 = 130, 300, 48
    k_bi, k_bu, k_u, k_v = jax.random.split(jax.random.PRNGKey(1), 4)
    bi2 = jax.random.uniform(k_bi, (itemNo2, 1), dtype=jnp.float32)
    bu2 = jax.random.uniform(k_bu, (userNo2, 1), dtype=jnp.float32)
    U2 = jax.random.uniform(k_u, (h2, userNo2), dtype=jnp.float32)
    V2 = jax.random.uniform(k_v, (itemNo2, h2), dtype=jnp.float32)
    out2 = jax.block_until_ready(mf_forward(bi2, bu2, U2, V2))
    ref2 = bi2 + bu2.T + V2 @ U2
    assert out2.shape == (itemNo2, userNo2)
    assert jnp.allclose(out2, ref2, atol=1e-5, rtol=1e-5)

    print("KERNEL_OK")
</pallas_src>

<mosaic_0001>
module attributes {stable_mosaic.version = 11 : i64} {
  func.func @mf_kernel(%arg0: i32, %arg1: i32, %arg2: memref<128x1xf32, #tpu.memory_space<vmem>>, %arg3: memref<1x128xf32, #tpu.memory_space<vmem>>, %arg4: memref<128x32xf32, #tpu.memory_space<vmem>>, %arg5: memref<2x32x128xf32, #tpu.memory_space<vmem>>, %arg6: memref<128x128xf32, #tpu.memory_space<vmem>>) attributes {dimension_semantics = [#tpu.dimension_semantics<parallel>, #tpu.dimension_semantics<parallel>], iteration_bounds = array<i64: 1, 2>, scalar_prefetch = 0 : i64, scratch_operands = 0 : i64, tpu.core_type = #tpu.core_type<tc>, window_params = [{transform_indices = @transform_0, window_bounds = array<i64: 128, 1>}, {transform_indices = @transform_1, window_bounds = array<i64: 1, 128>}, {transform_indices = @transform_2, window_bounds = array<i64: 128, 32>}, {pipeline_mode = #tpu.pipeline_mode<synchronous>, transform_indices = @transform_3, window_bounds = array<i64: 2, 32, 128>}, {transform_indices = @transform_4, window_bounds = array<i64: 128, 128>}]} {
    %0 = arith.index_cast %arg1 : i32 to index
    %c0 = arith.constant 0 : index
    %c0_0 = arith.constant 0 : index
    %1 = vector.load %arg5[%0, %c0, %c0_0] : memref<2x32x128xf32, #tpu.memory_space<vmem>>, vector<1x32x128xf32>
    %2 = vector.shape_cast %1 : vector<1x32x128xf32> to vector<32x128xf32>
    %c0_1 = arith.constant 0 : index
    %c0_2 = arith.constant 0 : index
    %3 = vector.load %arg4[%c0_1, %c0_2] : memref<128x32xf32, #tpu.memory_space<vmem>>, vector<128x32xf32>
    %cst = arith.constant dense<0.000000e+00> : vector<128x128xf32>
    %4 = tpu.matmul %3, %2, %cst {dimension_numbers = #tpu.dot_dimension_numbers<[1], [0], [0], [1], [0, 0, 1, 1], [], []>} : vector<128x32xf32>, vector<32x128xf32>, vector<128x128xf32> -> vector<128x128xf32>
    %c0_3 = arith.constant 0 : index
    %c0_4 = arith.constant 0 : index
    %5 = vector.load %arg2[%c0_3, %c0_4] : memref<128x1xf32, #tpu.memory_space<vmem>>, vector<128x1xf32>
    %6 = vector.broadcast %5 : vector<128x1xf32> to vector<128x128xf32>
    %7 = arith.addf %4, %6 : vector<128x128xf32>
    %c0_5 = arith.constant 0 : index
    %c0_6 = arith.constant 0 : index
    %8 = vector.load %arg3[%c0_5, %c0_6] : memref<1x128xf32, #tpu.memory_space<vmem>>, vector<1x128xf32>
    %9 = vector.broadcast %8 : vector<1x128xf32> to vector<128x128xf32>
    %10 = arith.addf %7, %9 : vector<128x128xf32>
    %c0_7 = arith.constant 0 : index
    %c0_8 = arith.constant 0 : index
    %11 = vector.load %arg6[%c0_7, %c0_8] : memref<128x128xf32, #tpu.memory_space<vmem>>, vector<128x128xf32>
    tpu.vector_store %arg6[%c0_7, %c0_8], %10 {strides = array<i32>} : memref<128x128xf32, #tpu.memory_space<vmem>>, vector<128x128xf32>,
    return
  }
  func.func @transform_0(%arg0: i32, %arg1: i32) -> (i32, i32) {
    %c0_i32 = arith.constant 0 : i32
    %c0_i32_0 = arith.constant 0 : i32
    return %arg0, %c0_i32 : i32, i32
  }
  func.func @transform_1(%arg0: i32, %arg1: i32) -> (i32, i32) {
    %c0_i32 = arith.constant 0 : i32
    %c0_i32_0 = arith.constant 0 : i32
    return %c0_i32, %arg1 : i32, i32
  }
  func.func @transform_2(%arg0: i32, %arg1: i32) -> (i32, i32) {
    %c0_i32 = arith.constant 0 : i32
    %c0_i32_0 = arith.constant 0 : i32
    return %arg0, %c0_i32 : i32, i32
  }
  func.func @transform_3(%arg0: i32, %arg1: i32) -> (i32, i32, i32) {
    %c0_i32 = arith.constant 0 : i32
    %c0_i32_0 = arith.constant 0 : i32
    %c0_i32_1 = arith.constant 0 : i32
    %c0_i32_2 = arith.constant 0 : i32
    return %c0_i32, %c0_i32_0, %c0_i32_1 : i32, i32, i32
  }
  func.func @transform_4(%arg0: i32, %arg1: i32) -> (i32, i32) {
    %c0_i32 = arith.constant 0 : i32
    return %arg0, %arg1 : i32, i32
  }
}

</mosaic_0001>

<bundles_post_ra>
// kernel: mf_forward.1
= control target key start
LH: loop header
LB: loop body
LE: loop exit
PB: predicated region body
PF: predicated region fallthrough
CT: control target
= control target key end

     0   :  { %9 = vsyncpa [#allocation3], 0  ;;  %s1260_s0 = inlined_call_operand.vmem [shape: f32[128,1], index: 0, kind: input, shape index: {}]   ;;  %s1261_s1 = inlined_call_operand.vmem [shape: f32[1,256], index: 1, kind: input, shape index: {}]   ;;  %s1262_s2 = inlined_call_operand.vmem [shape: f32[128,32], index: 2, kind: input, shape index: {}]   ;;  %s1263_s3 = inlined_call_operand.vmem [shape: f32[2,32,128], index: 3, kind: input, shape index: {}]   ;;  %s1264_s4 = inlined_call_operand.hbm [shape: f32[128,256], index: 4, kind: output, shape index: {}]  }
   0x1   :  { %11 = vsyncpa [#allocation3 + $0x1], 0  ;;  %s982_s15 = smov 0   ;;  %s984_s16 = smov 0  }
   0x2   :  { %s986_s17 = smov 0   ;;  %s988_s18 = smov 0  }
   0x3   :  { %s990_s19 = smov 0   ;;  %s992_s20 = smov 0  }
   0x4 LB: > { %s717_s21 = sadd.s32 4294967295, %s950_s20   ;;  %s718_s22 = sadd.s32 4294967294, %s950_s20   ;;  %s950_s20 = sphi %s992_s20, %s17_s20   ;;  %s946_s19 = sphi %s990_s19, %s1271_s19   ;;  %s942_s18 = sphi %s988_s18, %s1270_s18   ;;  %s938_s17 = sphi %s986_s17, %s1269_s17   ;;  %s934_s16 = sphi %s984_s16, %s1268_s16   ;;  %s930_s15 = sphi %s982_s15, %s1267_s15  }
   0x5   : > { %s26_s23 = sadd.s32 1, %s946_s19  ;;  %s137_s24 = sadd.s32 1, %s938_s17 }
   0x6   : > { %p27_p0 = scmp.ge.s32.totalorder %s26_s23, 2  ;;  %p147_p1 = scmp.ne.s32.totalorder %s938_s17, %s934_s16 }
   0x7   : > { %p148_p2 = scmp.eq.s32.totalorder %s717_s21, 1  ;;  %p153_p3 = scmp.ne.s32.totalorder %s934_s16, %s930_s15 }
   0x8   : > { %s1273_s23 = smov (%p27_p0, %s26_s23), 0  ;;  %p154_p5 = scmp.eq.s32.totalorder %s718_s22, 1 }
   0x9   : > { %p1022_p4 = por %p148_p2, %p147_p1  ;;  %s133_s26 = ssub.s32 %s946_s19, %s1273_s23 }
   0xa   : > { %p723_p6 = scmp.ge.s32.totalorder %s950_s20, 1  ;;  %p135_p7 = scmp.eq.s32.totalorder %s133_s26, 0 }
   0xb   : > { %p1029_p8 = por %p154_p5, %p153_p3  ;;  %p199_p9 = scmp.lt.s32.totalorder %s950_s20, 3 }
   0xc   : > { %s1035_s28 = scalar_select %p135_p7, %s938_s17, %s137_s24  }
   0xd   : > { %p200_p10 = pnand %p723_p6, %p199_p9 }
   0xe   : > { %s725_s29 = sshll.u32 (!%p200_p10), %s942_s18, 5  ;;  %v255_v0 = vld [vmem:[%s1262_s2] sm:$0xff] (!%p200_p10)  ;;  %vm367_vm0 = vcmask (!%p200_p10), 261120   ;;  %v952_v5 = vmov (!%p200_p10), 0   ;;  %v273_v9 = vld [vmem:[%s1260_s0 + $0x10] sm:$0xff] (!%p200_p10)  ;;  %v274_v11 = vld [vmem:[%s1260_s0 + $0x18] sm:$0xff] (!%p200_p10) }
   0xf   : > { %203 = sbr.rel (%p200_p10) target bundleno = 272 (0x110), region = 36  ;;  %v263_v1 = vld [vmem:[%s1262_s2 + $0x40] sm:$0xff] (!%p200_p10)  ;;  %s250_s10 = scalar_lea.vmem (!%p200_p10), %s1263_s3, %s725_s29  ;;  %775 = vmatprep.mubr.msk.f32.mxu0 (!%p200_p10), %vm367_vm0, %v255_v0  ;;  %871 = vset.pattern.permute.xlu1 (!%p200_p10), %v952_v5  ;;  %v272_v12 = vld [vmem:[%s1260_s0 + $0x8] sm:$0xff] (!%p200_p10)  ;;  %v257_v15 = vld [vmem:[%s1262_s2 + $0x10] sm:$0xff] (!%p200_p10) }
  0x10   : > { %787 = vmatprep.mubr.msk.f32.mxu1 (!%p200_p10), %vm367_vm0, %v263_v1  ;;  %v251_v2 = vld [vmem:[%s250_s10] sm:$0xff] (!%p200_p10)  ;;  %v252_v3 = vld [vmem:[%s250_s10 + $0x8] sm:$0xff] (!%p200_p10)  ;;  %v253_v4 = vld [vmem:[%s250_s10 + $0x10] sm:$0xff] (!%p200_p10)  ;;  %870 = vset.pattern.permute.xlu0 (!%p200_p10), %v952_v5  ;;  %p239_p11 = scmp.lt.s32.totalorder (!%p200_p10), %s942_s18, 1  ;;  %s230_s8 = sand.u32 (!%p200_p10), 1, %s934_s16  }
  0x11   : > { %v799_v6 = vpack.c.bf16 (!%p200_p10), %v252_v3, %v251_v2  ;;  %v254_v7 = vld [vmem:[%s250_s10 + $0x18] sm:$0xff] (!%p200_p10)  ;;  %v271_v10 = vld [vmem:[%s1260_s0] sm:$0xff] (!%p200_p10)  ;;  %299 = vperm.xlu1 (!%p200_p10), %871, %v273_v9   ;;  %v256_v13 = vld [vmem:[%s1262_s2 + $0x8] sm:$0xff] (!%p200_p10)  ;;  %s724_s12 = sshll.u32 (!%p200_p10), %s230_s8, 7  ;;  %s744_s14 = sshll.u32 (!%p200_p10), %s942_s18, 7 }
  0x12   : > { %v803_v8 = vpack.c.bf16 (!%p200_p10), %v254_v7, %v253_v4  ;;  %289 = vperm.xlu0 (!%p200_p10), %870, %v271_v10   ;;  %v264_v14 = vld [vmem:[%s1262_s2 + $0x48] sm:$0xff] (!%p200_p10)  ;;  %v265_v16 = vld [vmem:[%s1262_s2 + $0x50] sm:$0xff] (!%p200_p10)  ;;  %v275_v18 = vld [vmem:[%s1260_s0 + $0x20] sm:$0xff] (!%p200_p10)  ;;  %s1171_s13 = scalar_lea.vmem (!%p200_p10), [#allocation2], %s724_s12  ;;  %s1200_s24 = scalar_lea.hbm (!%p200_p10), %s1264_s4, %s744_s14 }
  0x13   : > { %800 = vmatprep.subr.bf16.mxu0 (!%p200_p10), %v799_v6  ;;  %807 = vmatprep.subr.bf16.mxu1 (!%p200_p10), %v799_v6  ;;  %v276_v17 = vld [vmem:[%s1260_s0 + $0x28] sm:$0xff] (!%p200_p10)  ;;  %v258_v19 = vld [vmem:[%s1262_s2 + $0x18] sm:$0xff] (!%p200_p10)  ;;  %v259_v21 = vld [vmem:[%s1262_s2 + $0x20] sm:$0xff] (!%p200_p10)  ;;  %s616_s21 = sshll.u32 (!%p200_p10), %s1171_s13, 4  ;;  %s1214_s26 = scalar_lea.sflag (!%p200_p10), [#allocation3], %s230_s8  ;;  %s1204_s21 = int_to_ptr.vmem [resolvable:$true] %s616_s21 }
  0x14   : > { %802 = vmatpush3.bf16.msra.mxu0 (!%p200_p10), %v799_v6  ;;  %809 = vmatpush3.bf16.msra.mxu1 (!%p200_p10), %v799_v6  ;;  %v266_v20 = vld [vmem:[%s1262_s2 + $0x58] sm:$0xff] (!%p200_p10)  ;;  %v267_v22 = vld [vmem:[%s1262_s2 + $0x60] sm:$0xff] (!%p200_p10)  ;;  %v277_v24 = vld [vmem:[%s1260_s0 + $0x30] sm:$0xff] (!%p200_p10)  ;;  %s872_s29 = scalar_lea.vmem (!%p200_p10), %s1204_s21, 2048  ;;  %s953_s30 = smov (!%p200_p10), [#allocation2]  }
  0x15   : > { %804 = vmatprep.subr.bf16.mxu0 (!%p200_p10), %v803_v8  ;;  %808 = vmatprep.subr.bf16.mxu1 (!%p200_p10), %v803_v8  ;;  %v278_v23 = vld [vmem:[%s1260_s0 + $0x38] sm:$0xff] (!%p200_p10)  ;;  %v260_v25 = vld [vmem:[%s1262_s2 + $0x28] sm:$0xff] (!%p200_p10)  ;;  %v261_v27 = vld [vmem:[%s1262_s2 + $0x30] sm:$0xff] (!%p200_p10)  ;;  %p873_p12 = scmp.ne.s32.totalorder (!%p200_p10), %s1204_s21, %s872_s29  ;;  %s876_s5 = sshll.u32 (!%p200_p10), %s953_s30, 4  ;;  %s877_s5 = int_to_ptr.vmem [resolvable:$false] %s876_s5 }
  0x16   : > { %304 = vperm.xlu1 %871, %v274_v11   ;;  %294 = vperm.xlu0 %870, %v272_v12   ;;  %v268_v26 = vld [vmem:[%s1262_s2 + $0x68] sm:$0xff]  ;;  %v269_v28 = vld [vmem:[%s1262_s2 + $0x70] sm:$0xff]  ;;  %v279_v30 = vld [vmem:[%s1260_s0 + $0x40] sm:$0xff]  ;;  %s240_s7 = scalar_select %p239_p11, %s942_s18, 1 }
  0x17   : > { %v280_v29 = vld [vmem:[%s1260_s0 + $0x48] sm:$0xff]  ;;  %v262_v31 = vld [vmem:[%s1262_s2 + $0x38] sm:$0xff]  ;;  %v281_v34 = vld [vmem:[%s1260_s0 + $0x50] sm:$0xff]  ;;  %p874_p13 = pnand %p873_p12, %p1022_p4  ;;  %s878_s6 = scalar_lea.vmem %s877_s5, 4096 }
  0x18   : > { %806 = vmatpush3.bf16.msra.mxu0 %v803_v8  ;;  %810 = vmatpush3.bf16.msra.mxu1 %v803_v8  ;;  %v270_v32 = vld [vmem:[%s1262_s2 + $0x78] sm:$0xff]  ;;  %v284_v35 = vld [vmem:[%s1260_s0 + $0x68] sm:$0xff]  ;;  %v283_v36 = vld [vmem:[%s1260_s0 + $0x60] sm:$0xff]  ;;  %s241_s11 = scalar_lea.vmem %s1261_s1, %s240_s7  ;;  %p879_p1 = scmp.lt.s32.totalorder %s1204_s21, %s877_s5 }
  0x19   : > { %v282_v33 = vld [vmem:[%s1260_s0 + $0x58] sm:$0xff]  ;;  %v285_v38 = vld [vmem:[%s1260_s0 + $0x70] sm:$0xff]  ;;  %v1165_v52 = vld [vmem:[%s241_s11] ss:$0 sm:$0xff]  ;;  %p875_p0 = pneg %p874_p13  ;;  %p880_p2 = scmp.lt.s32.totalorder %s878_s6, %s872_s29 }
  0x1a   : > { %314 = vperm.xlu1 %871, %v276_v17   ;;  %309 = vperm.xlu0 %870, %v275_v18   ;;  %v286_v37 = vld [vmem:[%s1260_s0 + $0x78] sm:$0xff] }
  0x1b   : > { %776 = vmatmul.mubr.msk.f32.vlgmr.msra.gmra.mrb[0].mxu0 %vm367_vm0, %v256_v13  ;;  %788 = vmatmul.mubr.msk.f32.vlgmr.msra.gmra.mrb[0].mxu1 %vm367_vm0, %v264_v14  ;;  %p881_p3 = por %p880_p2, %p879_p1 }
  0x1c   : > { %778 = vmatprep.mubr.msk.f32.mxu0 %vm367_vm0, %v257_v15  ;;  %790 = vmatprep.mubr.msk.f32.mxu1 %vm367_vm0, %v265_v16 }
  0x1d   : > { %p882_p5 = pnand %p881_p3, %p875_p0 }
  0x1e   : > { %324 = vperm.xlu1 %871, %v278_v23   ;;  %319 = vperm.xlu0 %870, %v277_v24  }
  0x1f   : > { %779 = vmatmul.mubr.msk.f32.gmra.mrb[2].mxu0 %vm367_vm0, %v258_v19  ;;  %791 = vmatmul.mubr.msk.f32.gmra.mrb[2].mxu1 %vm367_vm0, %v266_v20 }
  0x20   : > { %781 = vmatprep.mubr.msk.f32.mxu0 %vm367_vm0, %v259_v21  ;;  %793 = vmatprep.mubr.msk.f32.mxu1 %vm367_vm0, %v267_v22 }
  0x22   : > { %334 = vperm.xlu1 %871, %v280_v29   ;;  %329 = vperm.xlu0 %870, %v279_v30  }
  0x23   : > { %782 = vmatmul.mubr.msk.f32.gmra.mrb[4].mxu0 %vm367_vm0, %v260_v25  ;;  %794 = vmatmul.mubr.msk.f32.gmra.mrb[4].mxu1 %vm367_vm0, %v268_v26 }
  0x24   : > { %784 = vmatprep.mubr.msk.f32.mxu0 %vm367_vm0, %v261_v27  ;;  %796 = vmatprep.mubr.msk.f32.mxu1 %vm367_vm0, %v269_v28 }
  0x26   : > { %344 = vperm.xlu1 %871, %v282_v33   ;;  %339 = vperm.xlu0 %870, %v281_v34  }
  0x27   : > { %785 = vmatmul.mubr.msk.f32.gmra.mrb[6].mxu0 %vm367_vm0, %v262_v31  ;;  %797 = vmatmul.mubr.msk.f32.gmra.mrb[6].mxu1 %vm367_vm0, %v270_v32 }
  0x2a   : > { %354 = vperm.xlu1 %871, %v284_v35   ;;  %349 = vperm.xlu0 %870, %v283_v36  }
  0x2e   : > { %364 = vperm.xlu1 %871, %v286_v37   ;;  %359 = vperm.xlu0 %870, %v285_v38  }
  0x90   : > { %v300_v39 = vpop.permute.xlu1 %299 }
  0x91   : > { %v290_v40 = vpop.permute.xlu0 %289 }
  0x95   : > { %v305_v41 = vpop.permute.xlu1 %304  ;;  %v295_v42 = vpop.permute.xlu0 %294 }
  0x99   : > { %v315_v43 = vpop.permute.xlu1 %314  ;;  %v310_v44 = vpop.permute.xlu0 %309 }
  0x9d   : > { %v1153_v45 = vpop.permute.xlu1 %324  ;;  %v1155_v46 = vpop.permute.xlu0 %319 }
  0xa1   : > { %v335_v47 = vpop.permute.xlu1 %334  ;;  %v330_v48 = vpop.permute.xlu0 %329 }
  0xa5   : > { %v345_v49 = vpop.permute.xlu1 %344  ;;  %v340_v50 = vpop.permute.xlu0 %339 }
  0xa9   : > { %v355_v60 = vpop.permute.xlu1 %354  ;;  %v350_v61 = vpop.permute.xlu0 %349 }
  0xad   : > { %v365_v22 = vpop.permute.xlu1 %364  ;;  %v360_v23 = vpop.permute.xlu0 %359 }
  0xee   : > { %v777_v51 = vpop.f32.mrb[0].mxu0  ;;  %v789_v53 = vpop.f32.mrb[0].mxu1 }
  0xef   : > { %v488_v54 = vadd.f32 %v777_v51, %v295_v42  ;;  %v528_v55 = vadd.f32 %v789_v53, %v335_v47  ;;  %v482_v56 = vpop.f32.mrb[1].mxu0  ;;  %v522_v57 = vpop.f32.mrb[1].mxu1 }
  0xf0   : > { %v483_v58 = vadd.f32 %v482_v56, %v290_v40  ;;  %v523_v59 = vadd.f32 %v522_v57, %v330_v48 }
  0xf1   : > { %v569_v62 = vadd.f32 %v1165_v52, %v488_v54  ;;  %v577_v63 = vadd.f32 %v1165_v52, %v528_v55 }
  0xf2   : > { %v568_v0 = vadd.f32 %v1165_v52, %v483_v58  ;;  %v576_v1 = vadd.f32 %v1165_v52, %v523_v59  ;;  %v780_v2 = vpop.f32.mrb[2].mxu0  ;;  %v792_v3 = vpop.f32.mrb[2].mxu1 }
  0xf3   : > { %585 = vst [vmem:[%s1171_s13 + $0x8] sm:$0xff] %v569_v62  ;;  %593 = vst [vmem:[%s1171_s13 + $0x48] sm:$0xff] %v577_v63  ;;  %v498_v4 = vadd.f32 %v780_v2, %v305_v41  ;;  %v538_v5 = vadd.f32 %v792_v3, %v345_v49  ;;  %v492_v6 = vpop.f32.mrb[3].mxu0  ;;  %v532_v7 = vpop.f32.mrb[3].mxu1 }
  0xf4   : > { %584 = vst [vmem:[%s1171_s13] sm:$0xff] %v568_v0  ;;  %592 = vst [vmem:[%s1171_s13 + $0x40] sm:$0xff] %v576_v1  ;;  %v493_v8 = vadd.f32 %v492_v6, %v300_v39  ;;  %v533_v9 = vadd.f32 %v532_v7, %v340_v50 }
  0xf5   : > { %v571_v10 = vadd.f32 %v1165_v52, %v498_v4  ;;  %v579_v11 = vadd.f32 %v1165_v52, %v538_v5 }
  0xf6   : > { %v570_v12 = vadd.f32 %v1165_v52, %v493_v8  ;;  %v578_v13 = vadd.f32 %v1165_v52, %v533_v9  ;;  %v783_v14 = vpop.f32.mrb[4].mxu0  ;;  %v795_v15 = vpop.f32.mrb[4].mxu1 }
  0xf7   : > { %587 = vst [vmem:[%s1171_s13 + $0x18] sm:$0xff] %v571_v10  ;;  %595 = vst [vmem:[%s1171_s13 + $0x58] sm:$0xff] %v579_v11  ;;  %v508_v16 = vadd.f32 %v783_v14, %v315_v43  ;;  %v548_v17 = vadd.f32 %v795_v15, %v355_v60  ;;  %v502_v18 = vpop.f32.mrb[5].mxu0  ;;  %v542_v19 = vpop.f32.mrb[5].mxu1 }
  0xf8   : > { %586 = vst [vmem:[%s1171_s13 + $0x10] sm:$0xff] %v570_v12  ;;  %594 = vst [vmem:[%s1171_s13 + $0x50] sm:$0xff] %v578_v13  ;;  %v503_v20 = vadd.f32 %v502_v18, %v310_v44  ;;  %v543_v21 = vadd.f32 %v542_v19, %v350_v61 }
  0xf9   : > { %v573_v24 = vadd.f32 %v1165_v52, %v508_v16  ;;  %v581_v25 = vadd.f32 %v1165_v52, %v548_v17 }
  0xfa   : > { %v572_v26 = vadd.f32 %v1165_v52, %v503_v20  ;;  %v580_v27 = vadd.f32 %v1165_v52, %v543_v21  ;;  %v786_v28 = vpop.f32.mrb[6].mxu0  ;;  %v798_v29 = vpop.f32.mrb[6].mxu1 }
  0xfb   : > { %589 = vst [vmem:[%s1171_s13 + $0x28] sm:$0xff] %v573_v24  ;;  %597 = vst [vmem:[%s1171_s13 + $0x68] sm:$0xff] %v581_v25  ;;  %v518_v30 = vadd.f32 %v786_v28, %v1153_v45  ;;  %v558_v31 = vadd.f32 %v798_v29, %v365_v22  ;;  %v512_v32 = vpop.f32.mrb[7].mxu0  ;;  %v552_v33 = vpop.f32.mrb[7].mxu1 }
  0xfc   : > { %588 = vst [vmem:[%s1171_s13 + $0x20] sm:$0xff] %v572_v26  ;;  %596 = vst [vmem:[%s1171_s13 + $0x60] sm:$0xff] %v580_v27  ;;  %v513_v34 = vadd.f32 %v512_v32, %v1155_v46  ;;  %v553_v35 = vadd.f32 %v552_v33, %v360_v23 }
  0xfd   : > { %v575_v36 = vadd.f32 %v1165_v52, %v518_v30  ;;  %v583_v37 = vadd.f32 %v1165_v52, %v558_v31 }
  0xfe   : > { %v574_v38 = vadd.f32 %v1165_v52, %v513_v34  ;;  %v582_v39 = vadd.f32 %v1165_v52, %v553_v35 }
  0xff   : > { %591 = vst [vmem:[%s1171_s13 + $0x38] sm:$0xff] %v575_v36  ;;  %599 = vst [vmem:[%s1171_s13 + $0x78] sm:$0xff] %v583_v37 }
 0x100   : > { %590 = vst [vmem:[%s1171_s13 + $0x30] sm:$0xff] %v574_v38  ;;  %598 = vst [vmem:[%s1171_s13 + $0x70] sm:$0xff] %v582_v39 }
 0x101   : > { %885 = shalt.err (!%p882_p5)
}
 0x102   : > { %s886_s7 = scalar_lea.hbm %s1200_s24, 2048  ;;  %s890_s10 = scalar_lea.hbm %s1264_s4, 4096 }
 0x103   : > { %p887_p6 = scmp.ne.s32.totalorder %s1200_s24, %s886_s7  ;;  %p891_p10 = scmp.lt.u32.totalorder %s1200_s24, %s1264_s4 }
 0x104   : > { %p892_p11 = scmp.lt.u32.totalorder %s890_s10, %s886_s7  ;;  %p894_p13 = scmp.lt.u32.totalorder %s886_s7, %s1200_s24 }
 0x105   : > { %p888_p7 = pnand %p887_p6, %p1022_p4 }
 0x106   : > { %p893_p12 = por %p892_p11, %p891_p10 }
 0x107   : > { %p889_p9 = pneg %p888_p7 }
 0x108   : > { %p895_p0 = por %p894_p13, %p893_p12 }
 0x10a   : > { %p896_p1 = pnand %p895_p0, %p889_p9 }
 0x10c   : > { %899 = shalt.err (!%p896_p1)
}
 0x10d   : > { %s954_s13 = smov 128   ;;  %s955_s14 = smov 256  }
 0x10e   : > { %s956_s18 = smov 8  }
 0x10f   : > { %811 = dma.vmem_to_hbm [thread:$0]  (%p1022_p4), %s1204_s21, 2048, %s1200_s24, %s1214_s26, %s954_s13, %s955_s14, %s956_s18  }
 0x110 PF: > { %p817_p2 = scmp.ge.s32.totalorder %s950_s20, 2  ;;  %s631_s22 = sand.u32 1, %s930_s15  }
 0x111   : > { %s632_s29 = scalar_lea.sflag [#allocation3], %s631_s22 }
 0x112   : > { %p814_p3 = pnand %p817_p2, %p1029_p8 }
 0x114   : > { %925 = dma.done.wait (!%p814_p3), %s632_s29, 2048  }
 0x115   : > { %927 = vsyncadd (!%p814_p3), %s632_s29, 4294965248  ;;  %s17_s20 = sadd.s32 1, %s950_s20   ;;  %s1267_s15 = smov %s934_s16 }
 0x116   : > { %p14_p5 = scmp.ge.s32.totalorder %s17_s20, 4   ;;  %s1268_s16 = smov %s938_s17 }
 0x117   : > { %s1269_s17 = smov %s1035_s28  ;;  %s1270_s18 = smov %s946_s19 }
 0x118   : > { %s1271_s19 = smov %s1273_s23  ;;  %16 = sbr.rel (!%p14_p5) target bundleno = 4 (0x4), region = 78 }
 0x11f   :  { %637 = vsyncpa [#allocation3], 1 }
 0x120   :  { %639 = vsyncpa [#allocation3 + $0x1], 1 }

</bundles_post_ra>
